<compile_context>
chip_gen: v5e
topology: v5e:2x2
jax: 0.10.0
libtpu: 0.0.40
codegen_flags: <defaults>
</compile_context>

<pallas_src>
import jax
import jax.numpy as jnp
from jax.experimental import pallas as pl
from jax.experimental.pallas import tpu as pltpu

K, N = 3, 8          # logical problem size (in_features, out_features)
KP = 8               # sublane-padded weight rows; row K holds (bias + other)


def _linear_add_kernel(x_ref, w_ref, out_ref):
    # x_ref:   SMEM (1, K)    f32  -- the 3 input activations as scalars
    # w_ref:   VMEM (KP, N)   f32  -- rows 0..K-1: weight.T, row K: bias+other
    # out_ref: VMEM (1, N)    f32
    acc = w_ref[K:K + 1, :]                      # start from fused bias+other
    acc = acc + x_ref[0, 0] * w_ref[0:1, :]
    acc = acc + x_ref[0, 1] * w_ref[1:2, :]
    acc = acc + x_ref[0, 2] * w_ref[2:3, :]
    out_ref[...] = acc


def prepare_params(weight, bias, other):
    """One-time parameter prep (hoisted out of the per-call path).

    weight: (8, 3) [PyTorch layout], bias: (8,), other: (8,).
    Returns a single fused tile w_p: (KP, N) f32 with
      w_p[:K, :] = weight.T   and   w_p[K, :] = bias + other.
    """
    w_p = jnp.zeros((KP, N), jnp.float32)
    w_p = w_p.at[:K, :].set(weight.T.astype(jnp.float32))
    w_p = w_p.at[K, :].set((bias + other).astype(jnp.float32))
    return w_p


@jax.jit
def linear_plus_other(x, w_p):
    """x: (1, 3) -> (1, 8) == x @ W.T + bias + other."""
    return pl.pallas_call(
        _linear_add_kernel,
        out_shape=jax.ShapeDtypeStruct((1, N), jnp.float32),
        in_specs=[
            pl.BlockSpec(memory_space=pltpu.MemorySpace.SMEM),  # x scalars
            pl.BlockSpec(memory_space=pltpu.MemorySpace.VMEM),  # fused W.T / bias+other
        ],
        out_specs=pl.BlockSpec(memory_space=pltpu.MemorySpace.VMEM),
    )(x, w_p)


if __name__ == "__main__":
    key = jax.random.PRNGKey(0)
    k_x, k_w, k_b, k_o = jax.random.split(key, 4)

    # Deterministic inputs/parameters (shapes follow the nn.Module).
    x1 = jax.random.normal(k_x, (1, 3), dtype=jnp.float32)
    weight = jax.random.normal(k_w, (8, 3), dtype=jnp.float32) * (1.0 / jnp.sqrt(3.0))
    bias = jax.random.normal(k_b, (8,), dtype=jnp.float32) * (1.0 / jnp.sqrt(3.0))
    other = jax.random.normal(k_o, (8,), dtype=jnp.float32)

    # One-time parameter prep (weight transpose + pad + bias/other fusion).
    w_p = jax.block_until_ready(prepare_params(weight, bias, other))

    out = jax.block_until_ready(linear_plus_other(x1, w_p))

    # Pure-JAX reference check.
    ref = x1 @ weight.T + bias + other
    assert out.shape == (1, 8), out.shape
    assert jnp.allclose(out, ref, atol=1e-5, rtol=1e-5), (out, ref)

    print("KERNEL_OK")
</pallas_src>

<mosaic_0001>
module attributes {stable_mosaic.version = 11 : i64} {
  func.func @_linear_add_kernel(%arg0: memref<1x3xf32, #tpu.memory_space<smem>>, %arg1: memref<8x8xf32, #tpu.memory_space<vmem>>, %arg2: memref<1x8xf32, #tpu.memory_space<vmem>>) attributes {dimension_semantics = [], scalar_prefetch = 0 : i64, scratch_operands = 0 : i64, tpu.core_type = #tpu.core_type<tc>} {
    %c3 = arith.constant 3 : index
    %c0 = arith.constant 0 : index
    %0 = vector.load %arg1[%c3, %c0] : memref<8x8xf32, #tpu.memory_space<vmem>>, vector<1x8xf32>
    %c0_0 = arith.constant 0 : index
    %c0_1 = arith.constant 0 : index
    %1 = memref.load %arg0[%c0_0, %c0_1] : memref<1x3xf32, #tpu.memory_space<smem>>
    %c0_2 = arith.constant 0 : index
    %c0_3 = arith.constant 0 : index
    %2 = vector.load %arg1[%c0_2, %c0_3] : memref<8x8xf32, #tpu.memory_space<vmem>>, vector<1x8xf32>
    %3 = vector.broadcast %1 : f32 to vector<1x8xf32>
    %4 = arith.mulf %3, %2 : vector<1x8xf32>
    %5 = arith.addf %0, %4 : vector<1x8xf32>
    %c0_4 = arith.constant 0 : index
    %c1 = arith.constant 1 : index
    %6 = memref.load %arg0[%c0_4, %c1] : memref<1x3xf32, #tpu.memory_space<smem>>
    %c1_5 = arith.constant 1 : index
    %c0_6 = arith.constant 0 : index
    %7 = vector.load %arg1[%c1_5, %c0_6] : memref<8x8xf32, #tpu.memory_space<vmem>>, vector<1x8xf32>
    %8 = vector.broadcast %6 : f32 to vector<1x8xf32>
    %9 = arith.mulf %8, %7 : vector<1x8xf32>
    %10 = arith.addf %5, %9 : vector<1x8xf32>
    %c0_7 = arith.constant 0 : index
    %c2 = arith.constant 2 : index
    %11 = memref.load %arg0[%c0_7, %c2] : memref<1x3xf32, #tpu.memory_space<smem>>
    %c2_8 = arith.constant 2 : index
    %c0_9 = arith.constant 0 : index
    %12 = vector.load %arg1[%c2_8, %c0_9] : memref<8x8xf32, #tpu.memory_space<vmem>>, vector<1x8xf32>
    %13 = vector.broadcast %11 : f32 to vector<1x8xf32>
    %14 = arith.mulf %13, %12 : vector<1x8xf32>
    %15 = arith.addf %10, %14 : vector<1x8xf32>
    %c0_10 = arith.constant 0 : index
    %c0_11 = arith.constant 0 : index
    %16 = vector.load %arg2[%c0_10, %c0_11] : memref<1x8xf32, #tpu.memory_space<vmem>>, vector<1x8xf32>
    tpu.vector_store %arg2[%c0_10, %c0_11], %15 {strides = array<i32>} : memref<1x8xf32, #tpu.memory_space<vmem>>, vector<1x8xf32>,
    return
  }
}

</mosaic_0001>

<bundles_post_ra>
// kernel: linear_plus_other.1
= control target key start
LH: loop header
LB: loop body
LE: loop exit
PB: predicated region body
PF: predicated region fallthrough
CT: control target
= control target key end

     0   :  { %7 = vsyncpa [#allocation5], 0  ;;  %s173_s0 = inlined_call_operand.hbm [shape: f32[1,3], index: 0, kind: input, shape index: {}]   ;;  %s174_s1 = inlined_call_operand.hbm [shape: f32[8,8], index: 1, kind: input, shape index: {}]   ;;  %s175_s2 = inlined_call_operand.hbm [shape: f32[1,8], index: 2, kind: output, shape index: {}]  }
   0x1   :  { %8 = vsyncpa [#allocation3], 0 }
   0x2   :  { %9 = vsyncpa [#allocation4], 0  ;;  %s15_s11 = sshll.u32 %s173_s0, 4  ;;  %s24_s14 = sshll.u32 %s174_s1, 4  ;;  %s16_s11 = int_to_ptr.hbm [resolvable:$true] %s15_s11  ;;  %s25_s14 = int_to_ptr.hbm [resolvable:$true] %s24_s14 }
   0x3   :  { %s146_s15 = smov [#allocation2]   ;;  %s147_s16 = smov [#allocation6]  }
   0x4   :  { %18 = dma.hbm_to_smem %s16_s11, 16, %s146_s15, [#allocation5]  }
   0x5   :  { %s26_s17 = sshll.u32 %s147_s16, 4  ;;  %s27_s17 = int_to_ptr.vmem [resolvable:$true] %s26_s17 }
   0x6   :  { %29 = dma.hbm_to_vmem [thread:$0]  %s25_s14, 128, %s27_s17, [#allocation3]  }
   0x7   :  { %140 = dma.done.wait [#allocation5], 16  }
   0x8   :  { %141 = vsyncadd [#allocation5], 4294967280 }
   0x9   :  { %142 = dma.done.wait [#allocation3], 128  }
   0xa   :  { %143 = vsyncadd [#allocation3], 4294967168 }
   0xb   :  { %38 = sfence }
   0xc   :  { %s40_s18 = sld [smem:[#allocation2]]  ;;  %v41_v0 = vld [vmem:[#allocation6] sm:$0x1]  ;;  %v46_v1 = vld [vmem:[#allocation6 + $0x1] sm:$0x1]  ;;  %s148_s1 = smov [#allocation7]  }
   0xd   :  { %s75_s19 = sld [smem:[#allocation2 + $0x1]]  ;;  %v39_v2 = vld [vmem:[#allocation6 + $0x3] sm:$0x1]  ;;  %v51_v4 = vld [vmem:[#allocation6 + $0x2] sm:$0x1]  ;;  %s62_s20 = sshll.u32 %s148_s1, 4  ;;  %s63_s20 = int_to_ptr.vmem [resolvable:$true] %s62_s20 }
   0xe   :  { %s76_s0 = sld [smem:[#allocation2 + $0x2]]  ;;  %s64_s23 = sshll.u32 %s175_s2, 4  ;;  %vm55_vm0 = vcmask 57344   ;;  %s65_s23 = int_to_ptr.hbm [resolvable:$true] %s64_s23 }
  0x12   :  { %v42_v3 = vstv %s40_s18 }
  0x13   :  { %v43_v5 = vmul.f32 %v42_v3, %v41_v0  ;;  %v47_v6 = vstv %s75_s19 }
  0x14   :  { %v48_v7 = vmul.f32 %v47_v6, %v46_v1  ;;  %v52_v8 = vstv %s76_s0 }
  0x15   :  { %v44_v9 = vadd.f32 %v43_v5, %v39_v2  ;;  %v53_v10 = vmul.f32 %v52_v8, %v51_v4 }
  0x17   :  { %v49_v11 = vadd.f32 %v48_v7, %v44_v9 }
  0x19   :  { %v54_v12 = vadd.f32 %v53_v10, %v49_v11 }
  0x1b   :  { %56 = vst.msk [vmem:[#allocation7] sm:$0x1] %vm55_vm0, %v54_v12 }
  0x1c   :  { %67 = dma.vmem_to_hbm [thread:$0]  %s63_s20, 16, %s65_s23, [#allocation4]  }
  0x1d   :  { %144 = dma.done.wait [#allocation4], 16  }
  0x1e   :  { %145 = vsyncadd [#allocation4], 4294967280 }
  0x1f   :  { %72 = vsyncpa [#allocation3], 1 }
  0x20   :  { %73 = vsyncpa [#allocation4], 1 }
  0x21   :  { %74 = vsyncpa [#allocation5], 1 }

</bundles_post_ra>
